<compile_context>
chip_gen: v5e
topology: v5e:2x2
jax: 0.10.0
libtpu: 0.0.40
codegen_flags: <defaults>
</compile_context>

<pallas_src>
import functools

import jax
import jax.numpy as jnp
from jax.experimental import pallas as pl
from jax.experimental.pallas import tpu as pltpu


def _sdpa_kernel(q_ref, k_ref, v_ref, out_ref, attn_ref, *, inv_temperature):
    # Block shapes:
    #   q_ref    : (1, G, TQ, D)
    #   k_ref    : (1, G, Lk, D)
    #   v_ref    : (1, G, Lk, D)
    #   out_ref  : (1, G, TQ, D)
    #   attn_ref : (1, G, TQ, Lk)
    q = q_ref[0]  # (G, TQ, D)
    k = k_ref[0]  # (G, Lk, D)
    v = v_ref[0]  # (G, Lk, D)

    # Scale with a precomputed reciprocal (folded at trace time -> one vmul).
    qs = q * jnp.asarray(inv_temperature, dtype=q.dtype)

    # attn = (q / temperature) @ k^T, expressed as a contraction over D of both
    # operands so Mosaic feeds the MXU directly (no explicit transpose / XLU).
    attn_f32 = jnp.einsum("gqd,gkd->gqk", qs, k,
                          preferred_element_type=jnp.float32)

    # Returned attn is in the compute (input) dtype, like the PyTorch module,
    # and that exact tensor is the operand of the second matmul.
    attn = attn_f32.astype(attn_ref.dtype)

    out = jnp.einsum("gqk,gkd->gqd", attn, v,
                     preferred_element_type=jnp.float32)

    attn_ref[0] = attn
    out_ref[0] = out.astype(out_ref.dtype)


def _head_group_size(num_heads, head_dim):
    """Heads packed per grid step so the MXU / lane width approaches 128."""
    target = max(1, 128 // max(head_dim, 1))
    for g in range(min(num_heads, target), 0, -1):
        if num_heads % g == 0:
            return g
    return 1


def _vmem_caps():
    """(vmem_limit_bytes for CompilerParams, block working-set budget)."""
    try:
        cap = int(pltpu.get_tpu_info().vmem_capacity_bytes)
    except Exception:
        cap = 64 * 1024 * 1024  # conservative fallback (v7x per-TC VMEM)
    limit = min(int(cap * 0.85), 128 * 1024 * 1024)
    budget = int(cap * 0.60)
    return limit, budget


def _pick_q_tile(lq, lk, d, g, io_itemsize, attn_itemsize, budget):
    """Largest Lq tile (divisor of Lq, multiple of 8) whose double-buffered
    working set fits the per-generation VMEM budget."""
    if lq % 8 != 0:
        return lq  # ragged Lq: fall back to a full-array block (always legal)
    fallback = lq
    for tq in (1024, 512, 256, 128, 64, 32, 16, 8):
        if tq > lq or lq % tq != 0:
            continue
        vmem = 2 * (
            g * tq * d * io_itemsize          # q block
            + 2 * g * lk * d * io_itemsize    # k + v blocks (resident across Lq tiles)
            + g * tq * d * io_itemsize        # out block
            + g * tq * lk * attn_itemsize     # attn block (dominant term)
        )
        if vmem <= budget:
            return tq
        fallback = tq
    return fallback


def scaled_dot_product_attention(q, k, v, temperature):
    """q: [B, H, Lq, D], k/v: [B, H, Lk, D] -> (output, attn), both in q.dtype."""
    B, H, Lq, D = q.shape
    Lk = k.shape[2]
    compute_dtype = q.dtype
    itemsize = jnp.dtype(compute_dtype).itemsize

    G = _head_group_size(H, D)
    vmem_limit, block_budget = _vmem_caps()
    TQ = _pick_q_tile(Lq, Lk, D, G, itemsize, itemsize, block_budget)
    if Lq % TQ != 0:  # safety: only exact tilings reach the grid
        TQ = Lq
    n_q_tiles = Lq // TQ

    grid = (B, H // G, n_q_tiles)

    kernel = functools.partial(
        _sdpa_kernel, inv_temperature=1.0 / float(temperature)
    )

    out_shapes = (
        jax.ShapeDtypeStruct((B, H, Lq, D), compute_dtype),   # output
        jax.ShapeDtypeStruct((B, H, Lq, Lk), compute_dtype),  # attn (compute dtype, like PyTorch)
    )

    grid_spec = pltpu.PrefetchScalarGridSpec(
        num_scalar_prefetch=0,
        grid=grid,
        in_specs=[
            pl.BlockSpec((1, G, TQ, D), lambda b, hg, t: (b, hg, t, 0)),
            # k / v block indices are independent of the innermost Lq-tile axis,
            # so the same blocks stay resident in VMEM (no re-DMA between tiles).
            pl.BlockSpec((1, G, Lk, D), lambda b, hg, t: (b, hg, 0, 0)),
            pl.BlockSpec((1, G, Lk, D), lambda b, hg, t: (b, hg, 0, 0)),
        ],
        out_specs=[
            pl.BlockSpec((1, G, TQ, D), lambda b, hg, t: (b, hg, t, 0)),
            pl.BlockSpec((1, G, TQ, Lk), lambda b, hg, t: (b, hg, t, 0)),
        ],
    )

    # Advisory cost estimate for XLA scheduling around this memory-bound call.
    flops = 4 * B * H * Lq * Lk * D  # two matmuls, 2*M*N*K flops each
    bytes_accessed = (
        (q.size + k.size + v.size + B * H * Lq * D) * itemsize
        + B * H * Lq * Lk * itemsize
    )
    cost = pl.CostEstimate(
        flops=flops, transcendentals=0, bytes_accessed=bytes_accessed
    )

    return pl.pallas_call(
        kernel,
        out_shape=out_shapes,
        grid_spec=grid_spec,
        compiler_params=pltpu.CompilerParams(
            # No reduction axes: every grid step writes independent output
            # blocks, so all axes are megacore-shardable.
            dimension_semantics=("parallel", "parallel", "parallel"),
            vmem_limit_bytes=vmem_limit,
        ),
        cost_estimate=cost,
    )(q, k, v)


if __name__ == "__main__":
    # Small deterministic inputs consistent with the module's forward.
    B, H, Lq, Lk, D = 2, 2, 16, 16, 32
    temperature = float(D) ** 0.5

    key = jax.random.PRNGKey(0)
    kq, kk, kv = jax.random.split(key, 3)
    q = jax.random.normal(kq, (B, H, Lq, D), dtype=jnp.float32)
    k = jax.random.normal(kk, (B, H, Lk, D), dtype=jnp.float32)
    v = jax.random.normal(kv, (B, H, Lk, D), dtype=jnp.float32)

    output, attn = scaled_dot_product_attention(q, k, v, temperature)
    jax.block_until_ready((output, attn))

    # Reference check in plain JAX (highest precision so the reference itself
    # is not the noise source).
    attn_ref = jnp.einsum(
        "bhqd,bhkd->bhqk", q / temperature, k,
        precision=jax.lax.Precision.HIGHEST,
    )
    out_ref = jnp.einsum(
        "bhqk,bhkd->bhqd", attn_ref, v,
        precision=jax.lax.Precision.HIGHEST,
    )
    assert attn.dtype == q.dtype and output.dtype == q.dtype
    assert jnp.allclose(attn, attn_ref, atol=1e-4, rtol=1e-4)
    assert jnp.allclose(output, out_ref, atol=1e-4, rtol=1e-4)

    print("KERNEL_OK")
</pallas_src>

<mosaic_0001>
module attributes {stable_mosaic.version = 11 : i64} {
  func.func @_sdpa_kernel(%arg0: i32, %arg1: i32, %arg2: i32, %arg3: memref<1x2x16x32xf32, #tpu.memory_space<vmem>>, %arg4: memref<1x2x16x32xf32, #tpu.memory_space<vmem>>, %arg5: memref<1x2x16x32xf32, #tpu.memory_space<vmem>>, %arg6: memref<1x2x16x32xf32, #tpu.memory_space<vmem>>, %arg7: memref<1x2x16x16xf32, #tpu.memory_space<vmem>>) attributes {dimension_semantics = [#tpu.dimension_semantics<parallel>, #tpu.dimension_semantics<parallel>, #tpu.dimension_semantics<parallel>], iteration_bounds = array<i64: 2, 1, 1>, scalar_prefetch = 0 : i64, scratch_operands = 0 : i64, tpu.core_type = #tpu.core_type<tc>, window_params = [{transform_indices = @transform_0, window_bounds = array<i64: 1, 2, 16, 32>}, {transform_indices = @transform_1, window_bounds = array<i64: 1, 2, 16, 32>}, {transform_indices = @transform_2, window_bounds = array<i64: 1, 2, 16, 32>}, {transform_indices = @transform_3, window_bounds = array<i64: 1, 2, 16, 32>}, {transform_indices = @transform_4, window_bounds = array<i64: 1, 2, 16, 16>}]} {
    %c0 = arith.constant 0 : index
    %c0_0 = arith.constant 0 : index
    %c0_1 = arith.constant 0 : index
    %c0_2 = arith.constant 0 : index
    %0 = vector.load %arg3[%c0, %c0_0, %c0_1, %c0_2] : memref<1x2x16x32xf32, #tpu.memory_space<vmem>>, vector<1x2x16x32xf32>
    %1 = vector.shape_cast %0 : vector<1x2x16x32xf32> to vector<2x16x32xf32>
    %c0_3 = arith.constant 0 : index
    %c0_4 = arith.constant 0 : index
    %c0_5 = arith.constant 0 : index
    %c0_6 = arith.constant 0 : index
    %2 = vector.load %arg4[%c0_3, %c0_4, %c0_5, %c0_6] : memref<1x2x16x32xf32, #tpu.memory_space<vmem>>, vector<1x2x16x32xf32>
    %3 = vector.shape_cast %2 : vector<1x2x16x32xf32> to vector<2x16x32xf32>
    %c0_7 = arith.constant 0 : index
    %c0_8 = arith.constant 0 : index
    %c0_9 = arith.constant 0 : index
    %c0_10 = arith.constant 0 : index
    %4 = vector.load %arg5[%c0_7, %c0_8, %c0_9, %c0_10] : memref<1x2x16x32xf32, #tpu.memory_space<vmem>>, vector<1x2x16x32xf32>
    %5 = vector.shape_cast %4 : vector<1x2x16x32xf32> to vector<2x16x32xf32>
    %cst = arith.constant 0.176776692 : f32
    %6 = vector.broadcast %cst : f32 to vector<2x16x32xf32>
    %7 = arith.mulf %1, %6 : vector<2x16x32xf32>
    "tpu.trace_start"() <{level = 10 : i32, message = "gqd,gkd->gqk"}> : () -> ()
    %cst_11 = arith.constant dense<0.000000e+00> : vector<2x16x16xf32>
    %8 = tpu.matmul %7, %3, %cst_11 {dimension_numbers = #tpu.dot_dimension_numbers<[2], [2], [1], [1], [0, 0, 0, 1, 1, 1], [0], [0]>} : vector<2x16x32xf32>, vector<2x16x32xf32>, vector<2x16x16xf32> -> vector<2x16x16xf32>
    "tpu.trace_stop"() : () -> ()
    "tpu.trace_start"() <{level = 10 : i32, message = "gqk,gkd->gqd"}> : () -> ()
    %cst_12 = arith.constant dense<0.000000e+00> : vector<2x16x32xf32>
    %9 = tpu.matmul %8, %5, %cst_12 {dimension_numbers = #tpu.dot_dimension_numbers<[2], [1], [1], [2], [0, 0, 0, 1, 1, 2], [0], [0]>} : vector<2x16x16xf32>, vector<2x16x32xf32>, vector<2x16x32xf32> -> vector<2x16x32xf32>
    "tpu.trace_stop"() : () -> ()
    %c0_13 = arith.constant 0 : index
    %c0_14 = arith.constant 0 : index
    %c0_15 = arith.constant 0 : index
    %c0_16 = arith.constant 0 : index
    %10 = vector.load %arg7[%c0_13, %c0_14, %c0_15, %c0_16] : memref<1x2x16x16xf32, #tpu.memory_space<vmem>>, vector<1x2x16x16xf32>
    %11 = vector.shape_cast %10 : vector<1x2x16x16xf32> to vector<2x16x16xf32>
    %12 = vector.shape_cast %8 : vector<2x16x16xf32> to vector<1x2x16x16xf32>
    tpu.vector_store %arg7[%c0_13, %c0_14, %c0_15, %c0_16], %12 {strides = array<i32>} : memref<1x2x16x16xf32, #tpu.memory_space<vmem>>, vector<1x2x16x16xf32>,
    %c0_17 = arith.constant 0 : index
    %c0_18 = arith.constant 0 : index
    %c0_19 = arith.constant 0 : index
    %c0_20 = arith.constant 0 : index
    %13 = vector.load %arg6[%c0_17, %c0_18, %c0_19, %c0_20] : memref<1x2x16x32xf32, #tpu.memory_space<vmem>>, vector<1x2x16x32xf32>
    %14 = vector.shape_cast %13 : vector<1x2x16x32xf32> to vector<2x16x32xf32>
    %15 = vector.shape_cast %9 : vector<2x16x32xf32> to vector<1x2x16x32xf32>
    tpu.vector_store %arg6[%c0_17, %c0_18, %c0_19, %c0_20], %15 {strides = array<i32>} : memref<1x2x16x32xf32, #tpu.memory_space<vmem>>, vector<1x2x16x32xf32>,
    return
  }
  func.func @transform_0(%arg0: i32, %arg1: i32, %arg2: i32) -> (i32, i32, i32, i32) {
    %c0_i32 = arith.constant 0 : i32
    %c0_i32_0 = arith.constant 0 : i32
    return %arg0, %arg1, %arg2, %c0_i32 : i32, i32, i32, i32
  }
  func.func @transform_1(%arg0: i32, %arg1: i32, %arg2: i32) -> (i32, i32, i32, i32) {
    %c0_i32 = arith.constant 0 : i32
    %c0_i32_0 = arith.constant 0 : i32
    %c0_i32_1 = arith.constant 0 : i32
    return %arg0, %arg1, %c0_i32, %c0_i32_0 : i32, i32, i32, i32
  }
  func.func @transform_2(%arg0: i32, %arg1: i32, %arg2: i32) -> (i32, i32, i32, i32) {
    %c0_i32 = arith.constant 0 : i32
    %c0_i32_0 = arith.constant 0 : i32
    %c0_i32_1 = arith.constant 0 : i32
    return %arg0, %arg1, %c0_i32, %c0_i32_0 : i32, i32, i32, i32
  }
  func.func @transform_3(%arg0: i32, %arg1: i32, %arg2: i32) -> (i32, i32, i32, i32) {
    %c0_i32 = arith.constant 0 : i32
    %c0_i32_0 = arith.constant 0 : i32
    return %arg0, %arg1, %arg2, %c0_i32 : i32, i32, i32, i32
  }
  func.func @transform_4(%arg0: i32, %arg1: i32, %arg2: i32) -> (i32, i32, i32, i32) {
    %c0_i32 = arith.constant 0 : i32
    %c0_i32_0 = arith.constant 0 : i32
    return %arg0, %arg1, %arg2, %c0_i32 : i32, i32, i32, i32
  }
}

</mosaic_0001>

<bundles_post_ra>
// kernel: tpu_custom_call.1
= control target key start
LH: loop header
LB: loop body
LE: loop exit
PB: predicated region body
PF: predicated region fallthrough
CT: control target
= control target key end

     0   :  { %s1307_s0 = inlined_call_operand.hbm [shape: f32[2,2,16,32], index: 0, kind: input, shape index: {}]   ;;  %s1308_s1 = inlined_call_operand.hbm [shape: f32[2,2,16,32], index: 1, kind: input, shape index: {}]   ;;  %s1309_s2 = inlined_call_operand.hbm [shape: f32[2,2,16,32], index: 2, kind: input, shape index: {}]   ;;  %s1310_s3 = inlined_call_operand.hbm [shape: f32[2,2,16,32], index: 3, kind: output, shape index: {0}]   ;;  %s1311_s4 = inlined_call_operand.hbm [shape: f32[2,2,16,16], index: 4, kind: output, shape index: {1}]  }
   0x1   :  { %1318 = sst [smem:[#allocation21_spill]] %s1308_s1 }
   0x2   :  { %10 = vsyncpa [#allocation3], 0 }
   0x3   :  { %12 = vsyncpa [#allocation3 + $0x1], 0 }
   0x4   :  { %13 = vsyncpa [#allocation6], 0 }
   0x5   :  { %15 = vsyncpa [#allocation6 + $0x1], 0 }
   0x6   :  { %16 = vsyncpa [#allocation4], 0 }
   0x7   :  { %18 = vsyncpa [#allocation4 + $0x1], 0 }
   0x8   :  { %19 = vsyncpa [#allocation10], 0 }
   0x9   :  { %21 = vsyncpa [#allocation10 + $0x1], 0  ;;  %s1111_s15 = smov 0   ;;  %s1113_s16 = smov 0  }
   0xa   :  { %s1115_s17 = smov 0   ;;  %s1117_s18 = smov 0  }
   0xb   :  { %s1119_s19 = smov 0   ;;  %s1121_s20 = smov 0  }
   0xc LB: > { %1319 = sst [smem:[#allocation15_spill]] %s1068_s17  ;;  %s1142_s21 = sadd.s32 4294967295, %s1080_s20   ;;  %s1080_s20 = sphi %s1121_s20, %s27_s20   ;;  %s1076_s19 = sphi %s1119_s19, %s1337_s19   ;;  %s1072_s18 = sphi %s1117_s18, %s1336_s18   ;;  %s1068_s17 = sphi %s1115_s17, %s1335_s17   ;;  %s1064_s16 = sphi %s1113_s16, %s1339_s16   ;;  %s1060_s15 = sphi %s1111_s15, %s1338_s15  }
   0xd   : > { %1320 = sst [smem:[#allocation16_spill]] %s1076_s19  ;;  %s748_s22 = sadd.s32 4294967294, %s1080_s20  }
   0xe   : > { %1321 = sst [smem:[#allocation17_spill]] %s1080_s20  ;;  %s46_s23 = sadd.s32 1, %s1076_s19 }
   0xf   : > { %s57_s24 = sadd.s32 1, %s1068_s17  ;;  %p48_p0 = scmp.ge.s32.totalorder %s46_s23, 2 }
  0x10   : > { %p64_p1 = scmp.ne.s32.totalorder %s1068_s17, %s1064_s16  ;;  %p65_p2 = scmp.eq.s32.totalorder %s1080_s20, 0 }
  0x11   : > { %p70_p3 = scmp.ne.s32.totalorder %s1064_s16, %s1060_s15  ;;  %s1341_s23 = smov (%p48_p0, %s46_s23), 0 }
  0x12   : > { %1322 = sst [smem:[#allocation18_spill]] %s1341_s23  ;;  %p1154_p4 = por %p65_p2, %p64_p1 }
  0x13   : > { %p71_p5 = scmp.eq.s32.totalorder %s1142_s21, 0  ;;  %s50_s26 = ssub.s32 %s1076_s19, %s1341_s23 }
  0x14   : > { %p154_p6 = scmp.eq.s32.totalorder %s1142_s21, 1  ;;  %p55_p7 = scmp.eq.s32.totalorder %s50_s26, 0 }
  0x15   : > { %p1162_p8 = por %p71_p5, %p70_p3  ;;  %p160_p10 = scmp.eq.s32.totalorder %s748_s22, 1 }
  0x16   : > { %p1166_p9 = por %p154_p6, %p64_p1  ;;  %p750_p12 = scmp.ge.s32.totalorder %s1080_s20, 2 }
  0x17   : > { %s1171_s29 = scalar_select %p55_p7, %s1068_s17, %s57_s24  }
  0x18   : > { %p1173_p11 = por %p160_p10, %p70_p3  ;;  %p818_p13 = scmp.lt.s32.totalorder %s1080_s20, 2 }
  0x19   : > { %1326 = sst [smem:[#allocation19_spill]] %s1171_s29  ;;  %s210_s5 = sand.u32 1, %s1068_s17  }
  0x1a   : > { %s1327_s30 = scalar_select %p1173_p11, 1, 0 }
  0x1b   : > { %s1180_s6 = sshll.u32 %s210_s5, 5  ;;  %s786_s7 = sshll.u32 %s1076_s19, 5 }
  0x1c   : > { %1328 = sst [smem:[#allocation20_spill]] %s1327_s30  ;;  %p1185_p0 = pnand %p818_p13, %p1154_p4 }
  0x1d   : > { %s237_s9 = sand.u32 1, %s1080_s20   ;;  %s1330_s1 = sld [smem:[#allocation21_spill]] }
  0x1e   : > { %s241_s14 = scalar_lea.vmem [#allocation5], %s1180_s6  ;;  %s238_s24 = scalar_lea.sflag [#allocation6], %s237_s9 }
  0x1f   : > { %s252_s22 = sshll.u32 %s241_s14, 4  ;;  %s1082_s26 = smov 128   ;;  %s253_s22 = int_to_ptr.vmem [resolvable:$true] %s252_s22 }
  0x20   : > { %s1083_s25 = smov 8   ;;  %p760_p1 = scmp.ge.s32.totalorder %s1080_s20, 1 }
  0x21   : > { %p285_p2 = scmp.lt.s32.totalorder %s1080_s20, 3  ;;  %s211_s9 = scalar_lea.sflag [#allocation3], %s210_s5 }
  0x22   : > { %s274_s29 = scalar_lea.hbm %s1309_s2, %s786_s7  ;;  %s266_s20 = scalar_lea.vmem [#allocation7], %s1180_s6 }
  0x23   : > { %s249_s12 = scalar_lea.hbm %s1330_s1, %s786_s7  ;;  %p1198_p3 = pnand %p760_p1, %p285_p2 }
  0x24   : > { %s250_s13 = sshll.u32 %s249_s12, 4  ;;  %s224_s12 = scalar_lea.hbm %s1307_s0, %s786_s7  ;;  %s251_s13 = int_to_ptr.hbm [resolvable:$true] %s250_s13 }
  0x25   : > { %807 = dma.hbm_to_vmem [thread:$0]  (!%p1185_p0), %s251_s13, 512, %s253_s22, %s238_s24, %s1082_s26, %s1082_s26, %s1083_s25  }
  0x26   : > { %s225_s14 = sshll.u32 %s224_s12, 4  ;;  %s214_s1 = scalar_lea.vmem [#allocation2], %s1180_s6  ;;  %s226_s14 = int_to_ptr.hbm [resolvable:$true] %s225_s14 }
  0x27   : > { %s227_s19 = sshll.u32 %s214_s1, 4  ;;  %s275_s17 = sshll.u32 %s274_s29, 4  ;;  %s228_s19 = int_to_ptr.vmem [resolvable:$true] %s227_s19  ;;  %s276_s17 = int_to_ptr.hbm [resolvable:$true] %s275_s17 }
  0x28   : > { %804 = dma.hbm_to_vmem [thread:$0]  (!%p1185_p0), %s226_s14, 512, %s228_s19, %s211_s9, %s1082_s26, %s1082_s26, %s1083_s25  }
  0x29   : > { %s277_s30 = sshll.u32 %s266_s20, 4  ;;  %289 = sbr.rel (%p1198_p3) target bundleno = 328 (0x148), region = 32  ;;  %s278_s30 = int_to_ptr.vmem [resolvable:$true] %s277_s30 }
  0x2a   : > { %810 = dma.hbm_to_vmem [thread:$0]  (!%p1185_p0), %s276_s17, 512, %s278_s30, %s238_s24, %s1082_s26, %s1082_s26, %s1083_s25  }
  0x2b   : > { %s1217_s1 = sand.u32 (!%p1198_p3), 1, %s1064_s16  }
  0x2c   : > { %s1220_s19 = sshll.u32 (!%p1198_p3), %s1217_s1, 5  ;;  %s292_s5 = scalar_lea.sflag (!%p1198_p3), [#allocation3], %s1217_s1 }
  0x2d   : > { %s295_s29 = scalar_lea.vmem (!%p1198_p3), [#allocation2], %s1220_s19 }
  0x2e   : > { %1043 = dma.done.wait (%p1162_p8), %s292_s5, 512  }
  0x2f   : > { %1045 = vsyncadd (%p1162_p8), %s292_s5, 4294966784  ;;  %s301_s17 = sand.u32 1, %s1142_s21   ;;  %s305_s23 = scalar_lea.vmem [#allocation5], %s1220_s19 }
  0x30   : > { %s302_s20 = scalar_lea.sflag [#allocation6], %s301_s17 }
  0x31   : > { %1047 = dma.done.wait (%p1162_p8), %s302_s20, 1024  }
  0x32   : > { %1049 = vsyncadd (%p1162_p8), %s302_s20, 4294966272  ;;  %vm380_vm0 = vcmask 261120   ;;  %v369_v0 = vld [vmem:[%s305_s23 + $0x8] sm:$0xff]  ;;  %v371_v1 = vld [vmem:[%s305_s23 + $0x18] sm:$0xff]  ;;  %s315_s21 = scalar_lea.vmem [#allocation7], %s1220_s19  ;;  %vm451_vm1 = vcmask 130048  }
  0x33   : > { %766 = vmatpush.xpose.msk.msra.mxu0 %vm380_vm0, %v369_v0  ;;  %770 = vmatpush.xpose.msk.msra.mxu1 %vm380_vm0, %v371_v1  ;;  %v364_v2 = vld [vmem:[%s295_s29] sm:$0xff]  ;;  %v366_v3 = vld [vmem:[%s295_s29 + $0x10] sm:$0xff]  ;;  %v373_v6 = vld [vmem:[%s315_s21 + $0x8] sm:$0xff]  ;;  %s355_s27 = scalar_lea.vmem [#allocation9], %s1220_s19  ;;  %s789_s6 = sshll.u32 %s1072_s18, 5 }
  0x34   : > { %v368_v4 = vld [vmem:[%s305_s23] sm:$0xff]  ;;  %v370_v5 = vld [vmem:[%s305_s23 + $0x10] sm:$0xff]  ;;  %v375_v7 = vld [vmem:[%s315_s21 + $0x18] sm:$0xff]  ;;  %v376_v8 = vmul.f32 0.17677669, %v364_v2  ;;  %472 = vmatpush.msra.mxu2 %v373_v6  ;;  %s563_s30 = sshll.u32 %s355_s27, 4  ;;  %s562_s24 = scalar_lea.hbm %s1311_s4, %s789_s6  ;;  %s564_s30 = int_to_ptr.vmem [resolvable:$true] %s563_s30 }
  0x35   : > { %v378_v9 = vmul.f32 0.17677669, %v366_v3  ;;  %501 = vmatpush.msra.mxu3 %v375_v7  ;;  %v365_v10 = vld [vmem:[%s295_s29 + $0x8] sm:$0xff]  ;;  %v367_v11 = vld [vmem:[%s295_s29 + $0x18] sm:$0xff]  ;;  %v372_v14 = vld [vmem:[%s315_s21] sm:$0xff]  ;;  %s565_s26 = sshll.u32 %s562_s24, 4  ;;  %s566_s26 = int_to_ptr.hbm [resolvable:$true] %s565_s26 }
  0x36   : > { %v377_v12 = vmul.f32 0.17677669, %v365_v10  ;;  %v379_v13 = vmul.f32 0.17677669, %v367_v11  ;;  %v374_v15 = vld [vmem:[%s315_s21 + $0x10] sm:$0xff]  ;;  %473 = vmatpush.msra.mxu2 %v372_v14  ;;  %s524_s25 = scalar_lea.sflag [#allocation10], %s1217_s1 }
  0x37   : > { %767 = vmatpush.xpose.msk.msra.mxu0 %vm380_vm0, %v368_v4  ;;  %771 = vmatpush.xpose.msk.msra.mxu1 %vm380_vm0, %v370_v5  ;;  %s976_s10 = sshra.s32 %s566_s26, 4  ;;  %s982_s9 = scalar_lea.hbm %s1311_s4, 64  ;;  %s977_s10 = int_to_ptr.hbm [resolvable:$true] %s976_s10 }
  0x38   : > { %502 = vmatpush.msra.mxu3 %v374_v15  ;;  %s978_s11 = scalar_lea.hbm %s977_s10, 32  ;;  %p983_p7 = scmp.lt.s32.totalorder %s977_s10, %s1311_s4 }
  0x39   : > { %p979_p4 = scmp.ne.s32.totalorder %s977_s10, %s978_s11  ;;  %p984_p8 = scmp.lt.s32.totalorder %s982_s9, %s978_s11 }
  0x3a   : > { %768 = vmatmul.msk.f32.vlgmr.msra.gmra.mxu0 %vm380_vm0, %v376_v8  ;;  %772 = vmatmul.msk.f32.vlgmr.msra.gmra.mxu1 %vm380_vm0, %v378_v9 }
  0x3b   : > { %p980_p5 = pnand %p979_p4, %p1166_p9  ;;  %p985_p10 = por %p984_p8, %p983_p7 }
  0x3d   : > { %p981_p6 = pneg %p980_p5 }
  0x3f   : > { %p986_p13 = pnand %p985_p10, %p981_p6 }
  0x42   : > { %769 = vmatmul.msk.f32.gmra.mxu0 %vm380_vm0, %v377_v12  ;;  %773 = vmatmul.msk.f32.gmra.mxu1 %vm380_vm0, %v379_v13 }
  0xb7   : > { %v410_v16 = vpop.f32.mrf.mxu0  ;;  %v445_v17 = vpop.f32.mrf.mxu1 }
  0xb8   : > { %510 = vst.msk [vmem:[%s355_s27] sm:$0xff] %vm451_vm1, %v410_v16  ;;  %774 = vmatmul.msk.f32.vlgmr.msra.gmra.mxu2 %vm451_vm1, %v410_v16  ;;  %776 = vmatmul.msk.f32.vlgmr.msra.gmra.mxu3 %vm451_vm1, %v445_v17 }
  0xb9   : > { %512 = vst.msk [vmem:[%s355_s27 + $0x10] sm:$0xff] %vm451_vm1, %v445_v17 }
  0xbf   : > { %v413_v18 = vpop.f32.mrf.mxu0  ;;  %v448_v19 = vpop.f32.mrf.mxu1 }
  0xc0   : > { %511 = vst.msk [vmem:[%s355_s27 + $0x8] sm:$0xff] %vm451_vm1, %v413_v18  ;;  %775 = vmatmul.msk.f32.gmra.mxu2 %vm451_vm1, %v413_v18  ;;  %777 = vmatmul.msk.f32.gmra.mxu3 %vm451_vm1, %v448_v19 }
  0xc1   : > { %513 = vst.msk [vmem:[%s355_s27 + $0x18] sm:$0xff] %vm451_vm1, %v448_v19 }
  0xc2   : > { %989 = shalt.err (!%p986_p13)
}
  0xc3   : > { %s1084_s22 = smov 128   ;;  %s1085_s5 = smov 8  }
  0xc4   : > { %798 = dma.vmem_to_hbm [thread:$0]  (%p1166_p9), %s564_s30, 512, %s566_s26, %s524_s25, %s1084_s22, %s1084_s22, %s1085_s5  }
  0xc5   : > { %s348_s29 = scalar_lea.vmem [#allocation8], %s1220_s19  ;;  %s540_s23 = scalar_lea.hbm %s1310_s3, %s789_s6 }
  0xc6   : > { %s541_s21 = sshll.u32 %s348_s29, 4  ;;  %s543_s27 = sshll.u32 %s540_s23, 4  ;;  %s542_s21 = int_to_ptr.vmem [resolvable:$true] %s541_s21  ;;  %s544_s27 = int_to_ptr.hbm [resolvable:$true] %s543_s27 }
  0xc7   : > { %s519_s19 = scalar_lea.sflag [#allocation4], %s1217_s1  ;;  %s1004_s30 = sshra.s32 %s544_s27, 4  ;;  %s1005_s30 = int_to_ptr.hbm [resolvable:$true] %s1004_s30 }
  0xc8   : > { %s1006_s7 = scalar_lea.hbm %s1005_s30, 32  ;;  %s1010_s24 = scalar_lea.hbm %s1310_s3, 64 }
  0xc9   : > { %p1007_p0 = scmp.ne.s32.totalorder %s1005_s30, %s1006_s7  ;;  %p1011_p3 = scmp.lt.s32.totalorder %s1005_s30, %s1310_s3 }
  0xca   : > { %p1012_p4 = scmp.lt.s32.totalorder %s1010_s24, %s1006_s7 }
  0xcb   : > { %p1008_p1 = pnand %p1007_p0, %p1166_p9 }
  0xcc   : > { %p1013_p5 = por %p1012_p4, %p1011_p3 }
  0xcd   : > { %p1009_p2 = pneg %p1008_p1 }
  0xcf   : > { %p1014_p6 = pnand %p1013_p5, %p1009_p2 }
 0x13b   : > { %v475_v20 = vpop.f32.mrf.mxu2  ;;  %v504_v21 = vpop.f32.mrf.mxu3 }
 0x13c   : > { %514 = vst.msk [vmem:[%s348_s29] sm:$0xff] %vm380_vm0, %v475_v20 }
 0x13d   : > { %516 = vst.msk [vmem:[%s348_s29 + $0x10] sm:$0xff] %vm380_vm0, %v504_v21 }
 0x143   : > { %v478_v22 = vpop.f32.mrf.mxu2  ;;  %v507_v23 = vpop.f32.mrf.mxu3 }
 0x144   : > { %515 = vst.msk [vmem:[%s348_s29 + $0x8] sm:$0xff] %vm380_vm0, %v478_v22 }
 0x145   : > { %517 = vst.msk [vmem:[%s348_s29 + $0x18] sm:$0xff] %vm380_vm0, %v507_v23 }
 0x146   : > { %1017 = shalt.err (!%p1014_p6)
}
 0x147   : > { %797 = dma.vmem_to_hbm [thread:$0]  (%p1166_p9), %s542_s21, 512, %s544_s27, %s519_s19, %s1084_s22, %s1084_s22, %s1085_s5  }
 0x148 PF: > { %s1333_s10 = sld [smem:[#allocation17_spill]]  ;;  %s580_s11 = sand.u32 1, %s1060_s15  }
 0x149   : > { %p812_p7 = pnand %p750_p12, %p1173_p11  ;;  %s581_s12 = scalar_lea.sflag [#allocation4], %s580_s11 }
 0x14b   : > { %p813_p8 = pneg %p812_p7 }
 0x14d   : > { %1051 = dma.done.wait (%p813_p8), %s581_s12, 512  }
 0x14e   : > { %1053 = vsyncadd (%p813_p8), %s581_s12, 4294966784  ;;  %s591_s14 = scalar_lea.sflag [#allocation10], %s580_s11 }
 0x14f   : > { %1055 = dma.done.wait (%p813_p8), %s591_s14, 512  }
 0x150   : > { %1057 = vsyncadd (%p813_p8), %s591_s14, 4294966784  ;;  %s27_s20 = sadd.s32 1, %s1333_s10   ;;  %s1334_s28 = sld [smem:[#allocation15_spill]] }
 0x151   : > { %p24_p10 = scmp.ge.s32.totalorder %s27_s20, 4   ;;  %s1335_s17 = sld [smem:[#allocation19_spill]] }
 0x152   : > { %s1336_s18 = sld [smem:[#allocation16_spill]]  ;;  %s1338_s15 = smov %s1064_s16 }
 0x153   : > { %s1337_s19 = sld [smem:[#allocation18_spill]]  ;;  %26 = sbr.rel (!%p24_p10) target bundleno = 12 (0xc), region = 118 }
 0x156   : > { %s1339_s16 = smov %s1334_s28 }
 0x158   :  { %597 = vsyncpa [#allocation3], 1 }
 0x159   :  { %599 = vsyncpa [#allocation3 + $0x1], 1 }
 0x15a   :  { %600 = vsyncpa [#allocation6], 1 }
 0x15b   :  { %602 = vsyncpa [#allocation6 + $0x1], 1 }
 0x15c   :  { %603 = vsyncpa [#allocation4], 1 }
 0x15d   :  { %605 = vsyncpa [#allocation4 + $0x1], 1 }
 0x15e   :  { %606 = vsyncpa [#allocation10], 1 }
 0x15f   :  { %608 = vsyncpa [#allocation10 + $0x1], 1 }

</bundles_post_ra>
